<compile_context>
chip_gen: v6e
topology: v6e:2x2x1
jax: 0.10.0
libtpu: 0.0.40
codegen_flags: <defaults>
</compile_context>

<pallas_src>
import functools
import numpy as np
import jax
import jax.numpy as jnp
from jax.experimental import pallas as pl
from jax.experimental.pallas import tpu as pltpu


# --------------------- host glue: bicubic interpolation matrix ---------------------
def _bicubic_interp_matrix_1d(w_in: int, w_out: int, A: float = -0.75) -> np.ndarray:
    """Matrix Mw [w_out, w_in] reproducing torch F.interpolate(mode='bicubic',
    align_corners=True) along one axis (other axis unchanged)."""
    M = np.zeros((w_out, w_in), dtype=np.float64)

    def cc1(t):  # |x| <= 1
        return ((A + 2.0) * t - (A + 3.0)) * t * t + 1.0

    def cc2(t):  # 1 < |x| < 2
        return ((A * t - 5.0 * A) * t + 8.0 * A) * t - 4.0 * A

    if w_out == 1:
        M[0, 0] = 1.0
        return M.astype(np.float32)

    scale = (w_in - 1) / (w_out - 1)  # align_corners=True
    for j in range(w_out):
        s = j * scale
        x0 = int(np.floor(s))
        t = s - x0
        coeffs = [cc2(t + 1.0), cc1(t), cc1(1.0 - t), cc2(2.0 - t)]
        for k, c in enumerate(coeffs):
            idx = min(max(x0 - 1 + k, 0), w_in - 1)  # border clamp
            M[j, idx] += c
    return M.astype(np.float32)


# ------------------------------ Pallas kernels (hot path) ------------------------------
def _resident_add_kernel(x_ref, pos_ref, o_ref, *, tn):
    # x_ref: (1, TN, D); pos_ref: full (N_pad, D) resident block -> slice this tile.
    n = pl.program_id(1)
    start = pl.multiple_of(n * tn, tn)
    o_ref[...] = x_ref[...] + pos_ref[pl.ds(start, tn), :]


def _tiled_add_kernel(x_ref, pos_ref, o_ref):
    # x_ref: (1, TN, D); pos_ref: (TN, D) tile -> broadcast add in x's dtype.
    o_ref[...] = x_ref[...] + pos_ref[...]


# ------------------------------ tiling / VMEM policy ------------------------------
_POS_RESIDENT_MAX_BYTES = 4 << 20   # keep pos fully resident in VMEM below this
_TARGET_TILE_BYTES = 4 << 20        # ~4 MiB x tiles: near HBM roofline on v6e/v7x
_VMEM_BUDGET_BYTES = 28 << 20       # hard cap -> safe under v7x 32 MiB scoped default


def _round_up(x: int, m: int) -> int:
    return ((x + m - 1) // m) * m


def _sublane_multiple(itemsize: int) -> int:
    # packed-tile second-to-last dim: 8 for f32, 16 for bf16, 32 for int8/fp8
    return max(8, 32 // max(1, itemsize))


def _pick_tile_n(n: int, row_bytes: int, sub: int, max_tile_bytes: int, b: int) -> int:
    tile_bytes = min(_TARGET_TILE_BYTES, max(row_bytes * sub, max_tile_bytes))
    rows = max(sub, (tile_bytes // max(1, row_bytes)) // sub * sub)
    tn = min(rows, _round_up(n, sub))
    # v7x has 2 TensorCores: make sure the "parallel" grid has >= 2 steps.
    if b * pl.cdiv(n, tn) < 2 and n > sub:
        tn = max(sub, _round_up(pl.cdiv(n, 2), sub))
    return tn


def add_position_embedding(x, pos, *, alias_x: bool = False):
    """out[b] = x[b] + pos.   x: [B, N, D],  pos: [N, D] (cast to x.dtype here)."""
    B, N, D = x.shape
    assert pos.shape == (N, D)
    pos = pos.astype(x.dtype)

    itemsize = x.dtype.itemsize
    sub = _sublane_multiple(itemsize)
    row_bytes = D * itemsize
    pos_bytes = N * row_bytes
    pos_resident = pos_bytes <= _POS_RESIDENT_MAX_BYTES

    if pos_resident:
        # x + out double-buffered (4 tiles) + resident pos (<= 2 buffers)
        max_tile_bytes = (_VMEM_BUDGET_BYTES - 2 * pos_bytes) // 4
    else:
        # x + out + pos tiles all double-buffered -> 6 tiles
        max_tile_bytes = _VMEM_BUDGET_BYTES // 6

    tn = _pick_tile_n(N, row_bytes, sub, max_tile_bytes, B)
    n_tiles = pl.cdiv(N, tn)

    # Pad pos rows so every (even ragged-last) tile slice is in-bounds.
    n_pad = n_tiles * tn
    if n_pad != N:
        pos = jnp.pad(pos, ((0, n_pad - N), (0, 0)))

    tile_bytes = tn * row_bytes
    if pos_resident:
        pos_spec = pl.BlockSpec((n_pad, D), lambda b, n: (0, 0))  # DMA'd once, re-fetch elided
        kernel = functools.partial(_resident_add_kernel, tn=tn)
        vmem_needed = 4 * tile_bytes + 2 * n_pad * row_bytes
    else:
        pos_spec = pl.BlockSpec((tn, D), lambda b, n: (n, 0))
        kernel = _tiled_add_kernel
        vmem_needed = 6 * tile_bytes
    vmem_limit = min(34 << 20, vmem_needed + (4 << 20))  # raise past v5e's 16 MiB default

    return pl.pallas_call(
        kernel,
        out_shape=jax.ShapeDtypeStruct((B, N, D), x.dtype),
        grid=(B, n_tiles),  # n innermost -> contiguous HBM streaming within a batch slab
        in_specs=[
            pl.BlockSpec((1, tn, D), lambda b, n: (b, n, 0)),  # x slice
            pos_spec,                                          # precomputed pos
        ],
        out_specs=pl.BlockSpec((1, tn, D), lambda b, n: (b, n, 0)),
        compiler_params=pltpu.CompilerParams(
            dimension_semantics=("parallel", "parallel"),  # megacore-friendly (v7x 2 TCs)
            vmem_limit_bytes=vmem_limit,
        ),
        input_output_aliases=({0: 0} if alias_x else {}),
    )(x, pos)


# ------------------------------- module wrapper -------------------------------
class PositionEmbeddingPallas:
    def __init__(self, num_embeddings, embedding_dim, in_hw, key):
        self.num_embeddings = num_embeddings
        self.embedding_dim = embedding_dim
        self.h, self.w = in_hw
        assert self.h * self.w == num_embeddings
        # matches nn.init.uniform_(weight, -0.1, 0.1) distribution (deterministic here)
        self.pos_weight = jax.random.uniform(
            key, (num_embeddings, embedding_dim),
            minval=-0.1, maxval=0.1, dtype=jnp.float32)
        self._mw_cache = {}  # w_new -> [w_new, w_old] bicubic matrix (device array)

    def _interp_matrix(self, w_new: int):
        if w_new not in self._mw_cache:
            self._mw_cache[w_new] = jnp.asarray(
                _bicubic_interp_matrix_1d(self.w, w_new))
        return self._mw_cache[w_new]

    def _pos_for(self, n_patches: int, training: bool):
        """Hoisted, batch-invariant precompute (plain XLA); the Pallas kernel only
        runs the memory-bound broadcast add."""
        if training:
            assert n_patches == self.num_embeddings, (
                "training branch expects exactly num_embeddings patches")
            return self.pos_weight  # no identity matmul
        assert n_patches % self.h == 0, "eval branch requires nr_patches % h == 0"
        w_new = n_patches // self.h
        Mw = self._interp_matrix(w_new)                      # [w_new, w_old]
        w3 = self.pos_weight.reshape(self.h, self.w, self.embedding_dim)
        # kron(I_h, Mw) @ W  ==  per-h-block  Mw @ W_h   (height axis is identity)
        pos = jnp.einsum("ow,hwd->hod", Mw, w3,
                         preferred_element_type=jnp.float32)
        return pos.reshape(self.h * w_new, self.embedding_dim)

    def __call__(self, x, training: bool):
        B, N, D = x.shape
        assert D == self.embedding_dim
        pos = self._pos_for(N, training)
        return add_position_embedding(x, pos)


# --------------------------------- demo / check ---------------------------------
if __name__ == "__main__":
    h, w = 4, 8
    num_embeddings = h * w        # 32
    embedding_dim = 128           # multiple of 128 -> lane-dense output stores
    B = 2

    key = jax.random.PRNGKey(0)
    k_w, k_x1, k_x2 = jax.random.split(key, 3)

    mod = PositionEmbeddingPallas(num_embeddings, embedding_dim, (h, w), k_w)

    # ---- training branch: x has exactly num_embeddings patches ----
    x_train = jax.random.normal(k_x1, (B, num_embeddings, embedding_dim), jnp.float32)
    out_train = jax.block_until_ready(mod(x_train, training=True))
    ref_train = np.asarray(x_train) + np.asarray(mod.pos_weight)[None]
    np.testing.assert_allclose(np.asarray(out_train), ref_train, rtol=1e-5, atol=1e-5)

    # ---- eval branch: nr_patches = h * w_new (bicubic width interpolation) ----
    w_new = 16
    N_eval = h * w_new
    x_eval = jax.random.normal(k_x2, (B, N_eval, embedding_dim), jnp.float32)
    out_eval = jax.block_until_ready(mod(x_eval, training=False))

    # independent reference via the full kron matrix (different compute path)
    Mw_np = _bicubic_interp_matrix_1d(w, w_new)
    M_full = np.kron(np.eye(h, dtype=np.float32), Mw_np)
    ref_eval = np.asarray(x_eval) + (M_full @ np.asarray(mod.pos_weight))[None]
    np.testing.assert_allclose(np.asarray(out_eval), ref_eval, rtol=1e-4, atol=1e-4)

    # ---- bf16 smoke test: add runs in x's dtype, tn aligned to 16-row packing ----
    x_bf16 = x_eval.astype(jnp.bfloat16)
    out_bf16 = jax.block_until_ready(mod(x_bf16, training=False))
    assert out_bf16.dtype == jnp.bfloat16 and out_bf16.shape == x_eval.shape
    np.testing.assert_allclose(np.asarray(out_bf16, dtype=np.float32), ref_eval,
                               rtol=5e-2, atol=5e-2)

    # ---- aliased (in-place) path: x donated, output reuses x's buffer ----
    x_donor = x_train + 0.0  # fresh buffer safe to donate
    aliased_fn = jax.jit(functools.partial(add_position_embedding, alias_x=True),
                         donate_argnums=(0,))
    out_alias = jax.block_until_ready(aliased_fn(x_donor, mod.pos_weight))
    np.testing.assert_allclose(np.asarray(out_alias), ref_train, rtol=1e-5, atol=1e-5)

    print("KERNEL_OK")
</pallas_src>

<mosaic_0001>
module attributes {stable_mosaic.version = 11 : i64} {
  func.func @_resident_add_kernel(%arg0: i32, %arg1: i32, %arg2: memref<1x32x128xf32, #tpu.memory_space<vmem>>, %arg3: memref<32x128xf32, #tpu.memory_space<vmem>>, %arg4: memref<1x32x128xf32, #tpu.memory_space<vmem>>) attributes {dimension_semantics = [#tpu.dimension_semantics<parallel>, #tpu.dimension_semantics<parallel>], iteration_bounds = array<i64: 2, 1>, scalar_prefetch = 0 : i64, scratch_operands = 0 : i64, tpu.core_type = #tpu.core_type<tc>, window_params = [{transform_indices = @transform_0, window_bounds = array<i64: 1, 32, 128>}, {pipeline_mode = #tpu.pipeline_mode<synchronous>, transform_indices = @transform_1, window_bounds = array<i64: 32, 128>}, {transform_indices = @transform_2, window_bounds = array<i64: 1, 32, 128>}]} {
    %c32_i32 = arith.constant 32 : i32
    %0 = arith.muli %arg1, %c32_i32 : i32
    %1 = tpu.assume_multiple %0, 32 : i32
    %c0 = arith.constant 0 : index
    %c0_0 = arith.constant 0 : index
    %c0_1 = arith.constant 0 : index
    %2 = vector.load %arg2[%c0, %c0_0, %c0_1] : memref<1x32x128xf32, #tpu.memory_space<vmem>>, vector<1x32x128xf32>
    %3 = arith.index_cast %1 : i32 to index
    %c0_2 = arith.constant 0 : index
    %4 = vector.load %arg3[%3, %c0_2] : memref<32x128xf32, #tpu.memory_space<vmem>>, vector<32x128xf32>
    %5 = vector.shape_cast %4 : vector<32x128xf32> to vector<1x32x128xf32>
    %6 = arith.addf %2, %5 : vector<1x32x128xf32>
    %c0_3 = arith.constant 0 : index
    %c0_4 = arith.constant 0 : index
    %c0_5 = arith.constant 0 : index
    %7 = vector.load %arg4[%c0_3, %c0_4, %c0_5] : memref<1x32x128xf32, #tpu.memory_space<vmem>>, vector<1x32x128xf32>
    tpu.vector_store %arg4[%c0_3, %c0_4, %c0_5], %6 {strides = array<i32>} : memref<1x32x128xf32, #tpu.memory_space<vmem>>, vector<1x32x128xf32>,
    return
  }
  func.func @transform_0(%arg0: i32, %arg1: i32) -> (i32, i32, i32) {
    %c0_i32 = arith.constant 0 : i32
    %c0_i32_0 = arith.constant 0 : i32
    return %arg0, %arg1, %c0_i32 : i32, i32, i32
  }
  func.func @transform_1(%arg0: i32, %arg1: i32) -> (i32, i32) {
    %c0_i32 = arith.constant 0 : i32
    %c0_i32_0 = arith.constant 0 : i32
    %c0_i32_1 = arith.constant 0 : i32
    return %c0_i32, %c0_i32_0 : i32, i32
  }
  func.func @transform_2(%arg0: i32, %arg1: i32) -> (i32, i32, i32) {
    %c0_i32 = arith.constant 0 : i32
    %c0_i32_0 = arith.constant 0 : i32
    return %arg0, %arg1, %c0_i32 : i32, i32, i32
  }
}

</mosaic_0001>

<bundles_post_ra>
// kernel: tpu_custom_call.1
= control target key start
LH: loop header
LB: loop body
LE: loop exit
PB: predicated region body
PF: predicated region fallthrough
CT: control target
= control target key end

     0   :  { %7 = vsyncpa [#allocation3], 0  ;;  %s775_s0 = inlined_call_operand.hbm [shape: f32[2,32,128], index: 0, kind: input, shape index: {}]   ;;  %s776_s1 = inlined_call_operand.hbm [shape: f32[32,128], index: 1, kind: input, shape index: {}]   ;;  %s777_s2 = inlined_call_operand.hbm [shape: f32[2,32,128], index: 2, kind: output, shape index: {}]  }
   0x1   :  { %9 = vsyncpa [#allocation3 + $0x1], 0 }
   0x2   :  { %10 = vsyncpa [#allocation6], 0 }
   0x3   :  { %11 = vsyncpa [#allocation4], 0 }
   0x4   :  { %13 = vsyncpa [#allocation4 + $0x1], 0  ;;  %s588_s9 = smov 0   ;;  %s590_s10 = smov 0  }
   0x5   :  { %s592_s11 = smov 0   ;;  %s594_s12 = smov 0  }
   0x6   :  { %s596_s13 = smov 0   ;;  %s598_s14 = smov 0  }
   0x7 LB: > { %s330_s15 = sadd.s32 4294967295, %s564_s14   ;;  %s331_s16 = sadd.s32 4294967294, %s564_s14   ;;  %s564_s14 = sphi %s598_s14, %s19_s14   ;;  %s560_s13 = sphi %s596_s13, %s797_s13   ;;  %s556_s12 = sphi %s594_s12, %s796_s12   ;;  %s552_s11 = sphi %s592_s11, %s795_s11   ;;  %s548_s10 = sphi %s590_s10, %s794_s10   ;;  %s544_s9 = sphi %s588_s9, %s793_s9  }
   0x8   : > { %p53_p0 = scmp.ne.s32.totalorder %s548_s10, %s544_s9  ;;  %p622_p1 = scmp.eq.s32.totalorder %s330_s15, 0 }
   0x9   : > { %p626_p2 = scmp.eq.s32.totalorder %s330_s15, 1  ;;  %p106_p3 = scmp.eq.s32.totalorder %s331_s16, 1 }
   0xa   : > { %p632_p4 = por %p622_p1, %p53_p0  ;;  %p332_p5 = scmp.ge.s32.totalorder %s564_s14, 1 }
   0xb   : > { %p637_p6 = por %p106_p3, %p53_p0  ;;  %p113_p7 = scmp.lt.s32.totalorder %s564_s14, 3 }
   0xc   : > { %s782_s19 = scalar_select %p632_p4, 1, 0 }
   0xd   : > { %s783_s20 = scalar_select %p637_p6, 1, 0 }
   0xe   : > { %p642_p8 = pnand %p332_p5, %p113_p7  ;;  %s566_s22 = smov [#allocation5]  }
   0xf   : > { %s125_s23 = sshll.u32 %s566_s22, 4  ;;  %s31_s25 = sadd.s32 1, %s560_s13  ;;  %s126_s23 = int_to_ptr.vmem [resolvable:$true] %s125_s23 }
  0x10   : > { %p357_p9 = pneg %p642_p8  ;;  %s437_s26 = scalar_lea.vmem %s126_s23, 512 }
  0x11   : > { %p438_p13 = scmp.ne.s32.totalorder %s126_s23, %s437_s26  ;;  %p445_p5 = scmp.lt.s32.totalorder %s126_s23, %s126_s23 }
  0x12   : > { %p651_p11 = pnand %p357_p9, %p622_p1  ;;  %p446_p7 = scmp.lt.s32.totalorder %s437_s26, %s437_s26 }
  0x14   : > { %p428_p12 = pneg %p651_p11  ;;  %p447_p6 = por %p446_p7, %p445_p5 }
  0x16   : > { %p440_p0 = pnand %p438_p13, %p428_p12 }
  0x18   : > { %p441_p3 = pneg %p440_p0 }
  0x1a   : > { %p448_p4 = pnand %p447_p6, %p441_p3 }
  0x1c   : > { %451 = shalt.err (!%p448_p4)
}
  0x1d   : > { %s779_s27 = smov 128   ;;  %s568_s28 = smov 8  }
  0x1e   : > { %360 = dma.hbm_to_vmem [thread:$0]  (!%p651_p11), %s776_s1, 512, %s126_s23, [#allocation6], %s779_s27, %s779_s27, %s568_s28  }
  0x1f   : > { %p33_p4 = scmp.ge.s32.totalorder %s31_s25, 2  ;;  %s40_s3 = sadd.s32 1, %s552_s11 }
  0x20   : > { %p47_p6 = scmp.ne.s32.totalorder %s552_s11, %s548_s10  ;;  %p48_p9 = scmp.eq.s32.totalorder %s564_s14, 0 }
  0x21   : > { %s799_s25 = smov (%p33_p4, %s31_s25), 0  ;;  %p370_p0 = scmp.lt.s32.totalorder %s564_s14, 2 }
  0x22   : > { %p672_p12 = por %p48_p9, %p47_p6  ;;  %p678_p13 = por %p626_p2, %p47_p6 }
  0x23   : > { %s35_s6 = ssub.s32 %s560_s13, %s799_s25  ;;  %s139_s7 = sand.u32 1, %s552_s11  }
  0x24   : > { %p38_p11 = scmp.eq.s32.totalorder %s35_s6, 0  ;;  %s335_s8 = sshll.u32 %s139_s7, 5 }
  0x25   : > { %s347_s16 = sshll.u32 %s560_s13, 9  ;;  %s143_s26 = scalar_lea.vmem [#allocation2], %s335_s8 }
  0x26   : > { %s687_s15 = scalar_select %p38_p11, %s552_s11, %s40_s3  }
  0x27   : > { %s151_s24 = scalar_lea.hbm %s775_s0, %s347_s16  ;;  %s152_s29 = sshll.u32 %s143_s26, 4  ;;  %s153_s29 = int_to_ptr.vmem [resolvable:$true] %s152_s29 }
  0x28   : > { %p695_p2 = pnand %p370_p0, %p672_p12  ;;  %s140_s30 = scalar_lea.sflag [#allocation3], %s139_s7 }
  0x29   : > { %s465_s6 = scalar_lea.vmem %s153_s29, 512  ;;  %s569_s3 = smov [#allocation2]  }
  0x2a   : > { %p454_p3 = pneg %p695_p2  ;;  %p466_p5 = scmp.ne.s32.totalorder %s153_s29, %s465_s6 }
  0x2b   : > { %s470_s27 = sshll.u32 %s569_s3, 4  ;;  %s471_s27 = int_to_ptr.vmem [resolvable:$false] %s470_s27 }
  0x2c   : > { %p468_p7 = pnand %p466_p5, %p454_p3  ;;  %s472_s16 = scalar_lea.vmem %s471_s27, 1024 }
  0x2d   : > { %p473_p6 = scmp.lt.s32.totalorder %s153_s29, %s471_s27  ;;  %p474_p9 = scmp.lt.s32.totalorder %s472_s16, %s465_s6 }
  0x2e   : > { %p469_p4 = pneg %p468_p7 }
  0x2f   : > { %p475_p11 = por %p474_p9, %p473_p6 }
  0x31   : > { %p476_p10 = pnand %p475_p11, %p469_p4 }
  0x33   : > { %479 = shalt.err (!%p476_p10)
}
  0x34   : > { %s789_s4 = smov 128   ;;  %164 = sbr.rel (%p642_p8) target bundleno = 85 (0x55), region = 28 }
  0x35   : > { %364 = dma.hbm_to_vmem [thread:$0]  (!%p695_p2), %s151_s24, 512, %s153_s29, %s140_s30, %s789_s4, %s789_s4, %s568_s28  }
  0x36   : > { %s709_s7 = sand.u32 (!%p642_p8), 1, %s548_s10   ;;  %p790_p12 = scmp.ne.s32.totalorder (!%p642_p8), %s782_s19, 0 }
  0x37   : > { %s339_s27 = sshll.u32 (!%p642_p8), %s709_s7, 5  ;;  %s167_s8 = scalar_lea.sflag (!%p642_p8), [#allocation3], %s709_s7 }
  0x38   : > { %s170_s22 = scalar_lea.vmem (!%p642_p8), [#allocation2], %s339_s27 }
  0x39   : > { %531 = dma.done.wait (%p790_p12), %s167_s8, 512  }
  0x3a   : > { %533 = vsyncadd (%p790_p12), %s167_s8, 4294966784 }
  0x3b   : > { %535 = dma.done.wait (%p622_p1), [#allocation6], 512  }
  0x3c   : > { %537 = vsyncadd (%p622_p1), [#allocation6], 4294966784  ;;  %s194_s21 = scalar_lea.vmem [#allocation7], %s339_s27  ;;  %s348_s23 = sshll.u32 %s556_s12, 9  ;;  %v198_v0 = vld [vmem:[%s170_s22] sm:$0xff]  ;;  %v199_v2 = vld [vmem:[%s170_s22 + $0x8] sm:$0xff] }
  0x3d   : > { %s231_s28 = sshll.u32 %s194_s21, 4  ;;  %v203_v1 = vld [vmem:[#allocation5] sm:$0xff]  ;;  %v204_v4 = vld [vmem:[#allocation5 + $0x8] sm:$0xff]  ;;  %v200_v5 = vld [vmem:[%s170_s22 + $0x10] sm:$0xff]  ;;  %s727_s12 = scalar_lea.hbm %s777_s2, %s348_s23  ;;  %s722_s28 = int_to_ptr.vmem [resolvable:$true] %s231_s28 }
  0x3e   : > { %v207_v3 = vadd.f32 %v203_v1, %v198_v0  ;;  %v205_v6 = vld [vmem:[#allocation5 + $0x10] sm:$0xff]  ;;  %v208_v7 = vadd.f32 %v204_v4, %v199_v2  ;;  %v201_v9 = vld [vmem:[%s170_s22 + $0x18] sm:$0xff]  ;;  %s216_s24 = scalar_lea.sflag [#allocation4], %s709_s7  ;;  %s480_s26 = scalar_lea.vmem %s722_s28, 512 }
  0x3f   : > { %v209_v8 = vadd.f32 %v205_v6, %v200_v5  ;;  %v206_v10 = vld [vmem:[#allocation5 + $0x18] sm:$0xff]  ;;  %p481_p1 = scmp.ne.s32.totalorder %s722_s28, %s480_s26  ;;  %s570_s29 = smov [#allocation7]  }
  0x40   : > { %211 = vst [vmem:[%s194_s21] sm:$0xff] %v207_v3  ;;  %v210_v11 = vadd.f32 %v206_v10, %v201_v9  ;;  %212 = vst [vmem:[%s194_s21 + $0x8] sm:$0xff] %v208_v7  ;;  %s484_s18 = sshll.u32 %s570_s29, 4  ;;  %s485_s18 = int_to_ptr.vmem [resolvable:$false] %s484_s18 }
  0x41   : > { %213 = vst [vmem:[%s194_s21 + $0x10] sm:$0xff] %v209_v8  ;;  %p482_p8 = pnand %p481_p1, %p678_p13  ;;  %s486_s30 = scalar_lea.vmem %s485_s18, 1024 }
  0x42   : > { %214 = vst [vmem:[%s194_s21 + $0x18] sm:$0xff] %v210_v11  ;;  %p487_p0 = scmp.lt.s32.totalorder %s722_s28, %s485_s18  ;;  %p488_p2 = scmp.lt.s32.totalorder %s486_s30, %s480_s26 }
  0x43   : > { %p483_p10 = pneg %p482_p8 }
  0x44   : > { %p489_p3 = por %p488_p2, %p487_p0 }
  0x46   : > { %p490_p5 = pnand %p489_p3, %p483_p10 }
  0x48   : > { %493 = shalt.err (!%p490_p5)
}
  0x49   : > { %s494_s6 = scalar_lea.hbm %s727_s12, 512  ;;  %s498_s4 = scalar_lea.hbm %s777_s2, 1024 }
  0x4a   : > { %p495_p7 = scmp.ne.s32.totalorder %s727_s12, %s494_s6  ;;  %p499_p9 = scmp.lt.s32.totalorder %s727_s12, %s777_s2 }
  0x4b   : > { %p500_p11 = scmp.lt.s32.totalorder %s498_s4, %s494_s6 }
  0x4c   : > { %p496_p4 = pnand %p495_p7, %p678_p13 }
  0x4d   : > { %p501_p12 = por %p500_p11, %p499_p9 }
  0x4e   : > { %p497_p6 = pneg %p496_p4 }
  0x50   : > { %p502_p1 = pnand %p501_p12, %p497_p6 }
  0x52   : > { %505 = shalt.err (!%p502_p1)
}
  0x53   : > { %s571_s22 = smov 128   ;;  %s572_s21 = smov 8  }
  0x54   : > { %355 = dma.vmem_to_hbm [thread:$0]  (%p678_p13), %s722_s28, 512, %s727_s12, %s216_s24, %s571_s22, %s571_s22, %s572_s21  }
  0x55 PF: > { %s246_s23 = sand.u32 1, %s544_s9   ;;  %p791_p8 = scmp.ne.s32.totalorder %s783_s20, 0 }
  0x56   : > { %p792_p10 = scmp.ge.s32.totalorder %s564_s14, 2  ;;  %s247_s17 = scalar_lea.sflag [#allocation4], %s246_s23 }
  0x58   : > { %p366_p0 = pnand %p792_p10, %p791_p8 }
  0x5a   : > { %p367_p2 = pneg %p366_p0 }
  0x5c   : > { %539 = dma.done.wait (%p367_p2), %s247_s17, 512  }
  0x5d   : > { %541 = vsyncadd (%p367_p2), %s247_s17, 4294966784  ;;  %s19_s14 = sadd.s32 1, %s564_s14   ;;  %s793_s9 = smov %s548_s10 }
  0x5e   : > { %p16_p3 = scmp.ge.s32.totalorder %s19_s14, 4   ;;  %s794_s10 = smov %s552_s11 }
  0x5f   : > { %s795_s11 = smov %s687_s15  ;;  %s796_s12 = smov %s560_s13 }
  0x60   : > { %s797_s13 = smov %s799_s25  ;;  %18 = sbr.rel (!%p16_p3) target bundleno = 7 (0x7), region = 78 }
  0x65   :  { %252 = vsyncpa [#allocation3], 1 }
  0x66   :  { %254 = vsyncpa [#allocation3 + $0x1], 1 }
  0x67   :  { %255 = vsyncpa [#allocation6], 1 }
  0x68   :  { %256 = vsyncpa [#allocation4], 1 }
  0x69   :  { %258 = vsyncpa [#allocation4 + $0x1], 1 }

</bundles_post_ra>
